<compile_context>
chip_gen: v6e
topology: v6e:2x2x1
jax: 0.10.0
libtpu: 0.0.40
codegen_flags: <defaults>
</compile_context>

<pallas_src>
import jax
import jax.numpy as jnp
from jax.experimental import pallas as pl
from jax.experimental.pallas import tpu as pltpu
from functools import partial


def _mlp_kernel(xT_ref, w1_ref, b1_ref, w2_ref, b2_ref, w3_ref, b3_ref, o_ref):
    xT = xT_ref[...]                                              # (D, block_b), lane-dense

    # fc1 + ReLU: (H1, D) @ (D, block_b) -> (H1, block_b), f32 accumulate on the MXU.
    h1 = jnp.dot(w1_ref[...], xT, preferred_element_type=jnp.float32) + b1_ref[...]
    h1 = jnp.maximum(h1, 0.0).astype(w2_ref.dtype)                # (H1, block_b)

    # fc2 + ReLU: (H2, H1) @ (H1, block_b) -> (H2, block_b).
    h2 = jnp.dot(w2_ref[...], h1, preferred_element_type=jnp.float32) + b2_ref[...]
    h2 = jnp.maximum(h2, 0.0).astype(w3_ref.dtype)                # (H2, block_b)

    # fc3: (1, H2) @ (H2, block_b) -> (1, block_b); lane-dense, unmasked full-lane store.
    out = jnp.dot(w3_ref[...], h2, preferred_element_type=jnp.float32) + b3_ref[...]
    o_ref[...] = out.astype(o_ref.dtype)


def _pick_block_b(B, requested):
    # Lane-dense unmasked stores want a multiple of 128; >= 2 grid steps so megacore
    # ("parallel") has something to shard and the x DMA overlaps compute.
    if B <= 128:
        return B
    blk = min(requested, max(128, B // 2))
    blk = max(128, (blk // 128) * 128)
    return blk


@partial(jax.jit, static_argnames=("block_b", "use_bf16"))
def mlp_forward(x, w1, b1, w2, b2, w3, b3, *, block_b=2048, use_bf16=True):
    """x: (B, D); weights in PyTorch layout: w1 (128, D), w2 (64, 128), w3 (1, 64);
    biases b1 (128,), b2 (64,), b3 (1,).  Returns (B, 1) in x.dtype."""
    B, D = x.shape
    H1 = w1.shape[0]     # 128
    H2 = w2.shape[0]     # 64
    out_dtype = x.dtype

    feed_dtype = jnp.bfloat16 if use_bf16 else x.dtype
    # Feature-major feed; single fused XLA transpose+cast pass over x.  Ideally the caller
    # supplies x already transposed / bf16 so even this pass disappears.
    xT = x.T.astype(feed_dtype)                                   # (D, B), lane-dense tiles
    w1f = w1.astype(feed_dtype)                                   # (H1, D)
    w2f = w2.astype(feed_dtype)                                   # (H2, H1)
    w3f = jnp.reshape(w3, (1, H2)).astype(feed_dtype)             # (1, H2)
    b1c = jnp.reshape(b1, (H1, 1)).astype(jnp.float32)            # column bias (broadcast over lanes)
    b2c = jnp.reshape(b2, (H2, 1)).astype(jnp.float32)
    b3s = jnp.reshape(b3, (1, 1)).astype(jnp.float32)

    blk = _pick_block_b(B, block_b)
    n_blocks = pl.cdiv(B, blk)
    padded_B = n_blocks * blk

    feed_isz = jnp.dtype(feed_dtype).itemsize
    cost = pl.CostEstimate(
        flops=2 * B * (D * H1 + H1 * H2 + H2),
        transcendentals=0,
        bytes_accessed=(B * D * feed_isz
                        + (H1 * D + H2 * H1 + H2) * feed_isz
                        + (H1 + H2 + 1) * 4
                        + padded_B * jnp.dtype(out_dtype).itemsize),
    )

    out = pl.pallas_call(
        _mlp_kernel,
        out_shape=jax.ShapeDtypeStruct((1, padded_B), out_dtype),
        grid=(n_blocks,),
        in_specs=[
            pl.BlockSpec((D, blk), lambda i: (0, i)),     # xT tile over batch (lane-dense)
            pl.BlockSpec((H1, D), lambda i: (0, 0)),      # w1 (full, resident)
            pl.BlockSpec((H1, 1), lambda i: (0, 0)),      # b1 column
            pl.BlockSpec((H2, H1), lambda i: (0, 0)),     # w2
            pl.BlockSpec((H2, 1), lambda i: (0, 0)),      # b2 column
            pl.BlockSpec((1, H2), lambda i: (0, 0)),      # w3 row
            pl.BlockSpec((1, 1), lambda i: (0, 0)),       # b3 scalar
        ],
        out_specs=pl.BlockSpec((1, blk), lambda i: (0, i)),  # lane-dense output slab
        compiler_params=pltpu.CompilerParams(
            dimension_semantics=("parallel",),
        ),
        cost_estimate=cost,
    )(xT, w1f, b1c, w2f, b2c, w3f, b3s)

    # (1, padded_B) -> (B, 1); padded tail rows (if any) are sliced off.
    return out[0, :B].reshape(B, 1).astype(out_dtype)


def init_linear(key, fan_in, fan_out, dtype=jnp.float32):
    # PyTorch nn.Linear layout: weight (out, in), bias (out,), U(-1/sqrt(fan_in), 1/sqrt(fan_in)).
    kw, kb = jax.random.split(key)
    bound = 1.0 / (fan_in ** 0.5)
    w = jax.random.uniform(kw, (fan_out, fan_in), dtype, minval=-bound, maxval=bound)
    b = jax.random.uniform(kb, (fan_out,), dtype, minval=-bound, maxval=bound)
    return w, b


if __name__ == "__main__":
    key = jax.random.PRNGKey(0)
    k_x, k1, k2, k3 = jax.random.split(key, 4)

    batch = 1024           # -> block_b = 512, 2 grid steps (both TCs busy on v7x)
    input_size = 32

    x = jax.random.normal(k_x, (batch, input_size), jnp.float32)
    w1, b1 = init_linear(k1, input_size, 128)
    w2, b2 = init_linear(k2, 128, 64)
    w3, b3 = init_linear(k3, 64, 1)

    # Pure-JAX reference (same semantics as the PyTorch forward: y = x @ W.T + b).
    h1 = jnp.maximum(x @ w1.T + b1, 0.0)
    h2 = jnp.maximum(h1 @ w2.T + b2, 0.0)
    ref = h2 @ w3.T + b3

    # Default bf16-feed path (f32 accumulate); activations are bf16 between layers,
    # so compare with a loosened tolerance.
    out_bf16 = mlp_forward(x, w1, b1, w2, b2, w3, b3)
    out_bf16 = jax.block_until_ready(out_bf16)
    assert out_bf16.shape == (batch, 1)
    assert jnp.allclose(out_bf16, ref, atol=5e-2, rtol=5e-2)

    # f32 path for a tight-tolerance correctness check.
    out_f32 = mlp_forward(x, w1, b1, w2, b2, w3, b3, use_bf16=False)
    out_f32 = jax.block_until_ready(out_f32)
    assert jnp.allclose(out_f32, ref, atol=1e-5, rtol=1e-5)

    print("KERNEL_OK")
</pallas_src>

<mosaic_0001>
module attributes {stable_mosaic.version = 11 : i64} {
  func.func @_mlp_kernel(%arg0: i32, %arg1: memref<32x512xbf16, #tpu.memory_space<vmem>>, %arg2: memref<128x32xbf16, #tpu.memory_space<vmem>>, %arg3: memref<128x1xf32, #tpu.memory_space<vmem>>, %arg4: memref<64x128xbf16, #tpu.memory_space<vmem>>, %arg5: memref<64x1xf32, #tpu.memory_space<vmem>>, %arg6: memref<1x64xbf16, #tpu.memory_space<vmem>>, %arg7: memref<1x1xf32, #tpu.memory_space<vmem>>, %arg8: memref<1x512xf32, #tpu.memory_space<vmem>>) attributes {dimension_semantics = [#tpu.dimension_semantics<parallel>], iteration_bounds = array<i64: 2>, scalar_prefetch = 0 : i64, scratch_operands = 0 : i64, tpu.core_type = #tpu.core_type<tc>, window_params = [{transform_indices = @transform_0, window_bounds = array<i64: 32, 512>}, {pipeline_mode = #tpu.pipeline_mode<synchronous>, transform_indices = @transform_1, window_bounds = array<i64: 128, 32>}, {pipeline_mode = #tpu.pipeline_mode<synchronous>, transform_indices = @transform_2, window_bounds = array<i64: 128, 1>}, {pipeline_mode = #tpu.pipeline_mode<synchronous>, transform_indices = @transform_3, window_bounds = array<i64: 64, 128>}, {pipeline_mode = #tpu.pipeline_mode<synchronous>, transform_indices = @transform_4, window_bounds = array<i64: 64, 1>}, {pipeline_mode = #tpu.pipeline_mode<synchronous>, transform_indices = @transform_5, window_bounds = array<i64: 1, 64>}, {pipeline_mode = #tpu.pipeline_mode<synchronous>, transform_indices = @transform_6, window_bounds = array<i64: 1, 1>}, {transform_indices = @transform_7, window_bounds = array<i64: 1, 512>}]} {
    %c0 = arith.constant 0 : index
    %c0_0 = arith.constant 0 : index
    %0 = vector.load %arg1[%c0, %c0_0] : memref<32x512xbf16, #tpu.memory_space<vmem>>, vector<32x512xbf16>
    %c0_1 = arith.constant 0 : index
    %c0_2 = arith.constant 0 : index
    %1 = vector.load %arg2[%c0_1, %c0_2] : memref<128x32xbf16, #tpu.memory_space<vmem>>, vector<128x32xbf16>
    %cst = arith.constant dense<0.000000e+00> : vector<128x512xf32>
    %2 = tpu.matmul %1, %0, %cst {dimension_numbers = #tpu.dot_dimension_numbers<[1], [0], [0], [1], [0, 0, 1, 1], [], []>} : vector<128x32xbf16>, vector<32x512xbf16>, vector<128x512xf32> -> vector<128x512xf32>
    %c0_3 = arith.constant 0 : index
    %c0_4 = arith.constant 0 : index
    %3 = vector.load %arg3[%c0_3, %c0_4] : memref<128x1xf32, #tpu.memory_space<vmem>>, vector<128x1xf32>
    %4 = vector.broadcast %3 : vector<128x1xf32> to vector<128x512xf32>
    %5 = arith.addf %2, %4 : vector<128x512xf32>
    %cst_5 = arith.constant 0.000000e+00 : f32
    %6 = vector.broadcast %cst_5 : f32 to vector<128x512xf32>
    %7 = arith.maximumf %5, %6 : vector<128x512xf32>
    %8 = arith.truncf %7 : vector<128x512xf32> to vector<128x512xbf16>
    %c0_6 = arith.constant 0 : index
    %c0_7 = arith.constant 0 : index
    %9 = vector.load %arg4[%c0_6, %c0_7] : memref<64x128xbf16, #tpu.memory_space<vmem>>, vector<64x128xbf16>
    %cst_8 = arith.constant dense<0.000000e+00> : vector<64x512xf32>
    %10 = tpu.matmul %9, %8, %cst_8 {dimension_numbers = #tpu.dot_dimension_numbers<[1], [0], [0], [1], [0, 0, 1, 1], [], []>} : vector<64x128xbf16>, vector<128x512xbf16>, vector<64x512xf32> -> vector<64x512xf32>
    %c0_9 = arith.constant 0 : index
    %c0_10 = arith.constant 0 : index
    %11 = vector.load %arg5[%c0_9, %c0_10] : memref<64x1xf32, #tpu.memory_space<vmem>>, vector<64x1xf32>
    %12 = vector.broadcast %11 : vector<64x1xf32> to vector<64x512xf32>
    %13 = arith.addf %10, %12 : vector<64x512xf32>
    %cst_11 = arith.constant 0.000000e+00 : f32
    %14 = vector.broadcast %cst_11 : f32 to vector<64x512xf32>
    %15 = arith.maximumf %13, %14 : vector<64x512xf32>
    %16 = arith.truncf %15 : vector<64x512xf32> to vector<64x512xbf16>
    %c0_12 = arith.constant 0 : index
    %c0_13 = arith.constant 0 : index
    %17 = vector.load %arg6[%c0_12, %c0_13] : memref<1x64xbf16, #tpu.memory_space<vmem>>, vector<1x64xbf16>
    %cst_14 = arith.constant dense<0.000000e+00> : vector<1x512xf32>
    %18 = tpu.matmul %17, %16, %cst_14 {dimension_numbers = #tpu.dot_dimension_numbers<[1], [0], [0], [1], [0, 0, 1, 1], [], []>} : vector<1x64xbf16>, vector<64x512xbf16>, vector<1x512xf32> -> vector<1x512xf32>
    %c0_15 = arith.constant 0 : index
    %c0_16 = arith.constant 0 : index
    %19 = vector.load %arg7[%c0_15, %c0_16] : memref<1x1xf32, #tpu.memory_space<vmem>>, vector<1x1xf32>
    %20 = vector.broadcast %19 : vector<1x1xf32> to vector<1x512xf32>
    %21 = arith.addf %18, %20 : vector<1x512xf32>
    %c0_17 = arith.constant 0 : index
    %c0_18 = arith.constant 0 : index
    %22 = vector.load %arg8[%c0_17, %c0_18] : memref<1x512xf32, #tpu.memory_space<vmem>>, vector<1x512xf32>
    tpu.vector_store %arg8[%c0_17, %c0_18], %21 {strides = array<i32>} : memref<1x512xf32, #tpu.memory_space<vmem>>, vector<1x512xf32>,
    return
  }
  func.func @transform_0(%arg0: i32) -> (i32, i32) {
    %c0_i32 = arith.constant 0 : i32
    %c0_i32_0 = arith.constant 0 : i32
    return %c0_i32, %arg0 : i32, i32
  }
  func.func @transform_1(%arg0: i32) -> (i32, i32) {
    %c0_i32 = arith.constant 0 : i32
    %c0_i32_0 = arith.constant 0 : i32
    %c0_i32_1 = arith.constant 0 : i32
    return %c0_i32, %c0_i32_0 : i32, i32
  }
  func.func @transform_2(%arg0: i32) -> (i32, i32) {
    %c0_i32 = arith.constant 0 : i32
    %c0_i32_0 = arith.constant 0 : i32
    %c0_i32_1 = arith.constant 0 : i32
    return %c0_i32, %c0_i32_0 : i32, i32
  }
  func.func @transform_3(%arg0: i32) -> (i32, i32) {
    %c0_i32 = arith.constant 0 : i32
    %c0_i32_0 = arith.constant 0 : i32
    %c0_i32_1 = arith.constant 0 : i32
    return %c0_i32, %c0_i32_0 : i32, i32
  }
  func.func @transform_4(%arg0: i32) -> (i32, i32) {
    %c0_i32 = arith.constant 0 : i32
    %c0_i32_0 = arith.constant 0 : i32
    %c0_i32_1 = arith.constant 0 : i32
    return %c0_i32, %c0_i32_0 : i32, i32
  }
  func.func @transform_5(%arg0: i32) -> (i32, i32) {
    %c0_i32 = arith.constant 0 : i32
    %c0_i32_0 = arith.constant 0 : i32
    %c0_i32_1 = arith.constant 0 : i32
    return %c0_i32, %c0_i32_0 : i32, i32
  }
  func.func @transform_6(%arg0: i32) -> (i32, i32) {
    %c0_i32 = arith.constant 0 : i32
    %c0_i32_0 = arith.constant 0 : i32
    %c0_i32_1 = arith.constant 0 : i32
    return %c0_i32, %c0_i32_0 : i32, i32
  }
  func.func @transform_7(%arg0: i32) -> (i32, i32) {
    %c0_i32 = arith.constant 0 : i32
    %c0_i32_0 = arith.constant 0 : i32
    return %c0_i32, %arg0 : i32, i32
  }
}

</mosaic_0001>

<bundles_post_ra>
// kernel: mlp_forward.1
= control target key start
LH: loop header
LB: loop body
LE: loop exit
PB: predicated region body
PF: predicated region fallthrough
CT: control target
= control target key end

     0   :  { %s2087_s0 = inlined_call_operand.vmem [shape: bf16[32,1024], index: 0, kind: input, shape index: {}]   ;;  %s2088_s1 = inlined_call_operand.vmem [shape: bf16[128,32], index: 1, kind: input, shape index: {}]   ;;  %s2089_s2 = inlined_call_operand.vmem [shape: f32[128,1], index: 2, kind: input, shape index: {}]   ;;  %s2090_s3 = inlined_call_operand.vmem [shape: bf16[64,128], index: 3, kind: input, shape index: {}]   ;;  %s2091_s4 = inlined_call_operand.vmem [shape: f32[64,1], index: 4, kind: input, shape index: {}]   ;;  %s2092_s5 = inlined_call_operand.vmem [shape: bf16[1,64], index: 5, kind: input, shape index: {}]   ;;  %s2093_s6 = inlined_call_operand.<no memory space> [shape: f32[1,1], index: 6, kind: input, shape index: {}]   ;;  %s2094_s7 = inlined_call_operand.hbm [shape: f32[1,1024], index: 7, kind: output, shape index: {}]  }
   0x1   :  { %v12_v0 = vstv %s2093_s6 }
   0x2   :  { %13 = vst [vmem:[#allocation2] sm:$0x1] %v12_v0 }
   0x3   :  { %14 = vsyncpa [#allocation5], 0 }
   0x4   :  { %16 = vsyncpa [#allocation5 + $0x1], 0  ;;  %s1577_s26 = smov 0   ;;  %s1579_s27 = smov 0  }
   0x5   :  { %s1581_s28 = smov 0   ;;  %s1583_s29 = smov 0  }
   0x6 LB: > { %s1347_s6 = sadd.s32 4294967295, %s1529_s29   ;;  %s1348_s30 = sadd.s32 4294967294, %s1529_s29   ;;  %s1529_s29 = sphi %s1583_s29, %s2145_s29   ;;  %s1525_s28 = sphi %s1581_s28, %s2144_s28   ;;  %s1521_s27 = sphi %s1579_s27, %s2143_s27   ;;  %s1517_s26 = sphi %s1577_s26, %s2142_s26  }
   0x7   : > { %s1600_s8 = sadd.s32 1, %s1529_s29   ;;  %s29_s9 = sadd.s32 1, %s1525_s28 }
   0x8   : > { %s26_s10 = ssub.s32 %s1529_s29, %s1600_s8  ;;  %p36_p0 = scmp.ne.s32.totalorder %s1525_s28, %s1521_s27 }
   0x9   : > { %p27_p1 = scmp.eq.s32.totalorder %s26_s10, 0  ;;  %p37_p2 = scmp.eq.s32.totalorder %s1529_s29, 0 }
   0xa   : > { %p192_p3 = scmp.eq.s32.totalorder %s1347_s6, 1  ;;  %p197_p4 = scmp.ne.s32.totalorder %s1521_s27, %s1517_s26 }
   0xb   : > { %s1613_s11 = scalar_select %p27_p1, %s1525_s28, %s29_s9  }
   0xc   : > { %p38_p5 = por %p37_p2, %p36_p0  ;;  %p1615_p6 = por %p192_p3, %p36_p0 }
   0xd   : > { %p198_p7 = scmp.eq.s32.totalorder %s1348_s30, 1  ;;  %p2099_p9 = scmp.ge.s32.totalorder %s1529_s29, 2 }
   0xf   : > { %p1619_p8 = por %p198_p7, %p197_p4  ;;  %232 = sbr.rel (%p2099_p9) target bundleno = 28 (0x1c), region = 40 }
  0x14   : > { %235 = sbr.rel (!%p38_p5) target bundleno = 28 (0x1c), region = 44  ;;  %s237_s14 = sand.u32 (%p38_p5), 1, %s1525_s28  }
  0x15   : > { %s1400_s15 = sshll.u32 (%p38_p5), %s1529_s29, 4  ;;  %s1351_s16 = sshll.u32 (%p38_p5), %s237_s14, 6 }
  0x16   : > { %s242_s19 = scalar_lea.vmem (%p38_p5), %s2087_s0, %s1400_s15  ;;  %s239_s20 = scalar_lea.vmem (%p38_p5), [#allocation3], %s1351_s16 }
  0x17   : > { %v255_v1 = vld [vmem:[%s242_s19] sm:$0xff] (%p38_p5)  ;;  %v257_v2 = vld [vmem:[%s242_s19 + $0x8] sm:$0xff] (%p38_p5) }
  0x18   : > { %v259_v3 = vld [vmem:[%s242_s19 + $0x20] sm:$0xff] (%p38_p5)  ;;  %256 = vst [vmem:[%s239_s20] sm:$0xff] (%p38_p5), %v255_v1  ;;  %258 = vst [vmem:[%s239_s20 + $0x8] sm:$0xff] (%p38_p5), %v257_v2  ;;  %v261_v4 = vld [vmem:[%s242_s19 + $0x28] sm:$0xff] (%p38_p5) }
  0x19   : > { %260 = vst [vmem:[%s239_s20 + $0x10] sm:$0xff] %v259_v3  ;;  %v263_v5 = vld [vmem:[%s242_s19 + $0x40] sm:$0xff]  ;;  %v265_v6 = vld [vmem:[%s242_s19 + $0x48] sm:$0xff]  ;;  %262 = vst [vmem:[%s239_s20 + $0x18] sm:$0xff] %v261_v4 }
  0x1a   : > { %264 = vst [vmem:[%s239_s20 + $0x20] sm:$0xff] %v263_v5  ;;  %266 = vst [vmem:[%s239_s20 + $0x28] sm:$0xff] %v265_v6  ;;  %v267_v7 = vld [vmem:[%s242_s19 + $0x60] sm:$0xff]  ;;  %v269_v8 = vld [vmem:[%s242_s19 + $0x68] sm:$0xff] }
  0x1b   : > { %268 = vst [vmem:[%s239_s20 + $0x30] sm:$0xff] %v267_v7  ;;  %270 = vst [vmem:[%s239_s20 + $0x38] sm:$0xff] %v269_v8 }
  0x1c PF: > { %p1354_p10 = scmp.ge.s32.totalorder %s1529_s29, 1  ;;  %p275_p11 = scmp.lt.s32.totalorder %s1529_s29, 3 }
  0x1e   : > { %p276_p12 = pnand %p1354_p10, %p275_p11 }
  0x20   : > { %279 = sbr.rel (%p276_p12) target bundleno = 805 (0x325), region = 67 }
  0x25   : > { %s1634_s21 = sand.u32 1, %s1521_s27   ;;  %v2095_v9 = vmov 0   ;;  %v1457_v18 = vld [vmem:[%s2088_s1] sm:$0xff]   ;;  %vm516_vm0 = vcmask 261120   ;;  %v354_v19 = vld [vmem:[%s2089_s2 + $0x70] sm:$0xff]  ;;  %v355_v21 = vld [vmem:[%s2089_s2 + $0x78] sm:$0xff] }
  0x26   : > { %s1355_s22 = sshll.u32 %s1634_s21, 6  ;;  %573 = vmatprep.mubr.bf16.mxu0 %v2095_v9  ;;  %686 = vmatprep.mubr.bf16.mxu1 %v2095_v9  ;;  %v352_v20 = vld [vmem:[%s2089_s2 + $0x60] sm:$0xff]  ;;  %v353_v22 = vld [vmem:[%s2089_s2 + $0x68] sm:$0xff]  ;;  %v350_v23 = vld [vmem:[%s2089_s2 + $0x50] sm:$0xff]  ;;  %vm1148_vm1 = vcmask 523264   ;;  %s1356_s10 = sshll.u32 %s1634_s21, 2 }
  0x27   : > { %1443 = vset.pattern.permute.xlu0 %v2095_v9  ;;  %1444 = vset.pattern.permute.xlu1 %v2095_v9  ;;  %s284_s23 = scalar_lea.vmem [#allocation3], %s1355_s22  ;;  %v1458_v24 = vld [vmem:[%s2088_s1 + $0x8] sm:$0xff]   ;;  %v351_v25 = vld [vmem:[%s2089_s2 + $0x58] sm:$0xff]  ;;  %v348_v26 = vld [vmem:[%s2089_s2 + $0x40] sm:$0xff]  ;;  %s1401_s14 = sshll.u32 %s1347_s6, 6 }
  0x28   : > { %v1445_v10 = vld [vmem:[%s284_s23 + $0x24] ss:$16 sps:$4 sm:$0xff]   ;;  %v1447_v11 = vld [vmem:[%s284_s23 + $0x2c] ss:$16 sps:$4 sm:$0xff]   ;;  %v1449_v12 = vld [vmem:[%s284_s23 + $0x20] ss:$16 sps:$4 sm:$0xff]   ;;  %428 = vperm.xlu0 %1443, %v354_v19   ;;  %418 = vperm.xlu1 %1444, %v352_v20   ;;  %s1281_s19 = scalar_lea.hbm %s2094_s7, %s1401_s14 }
  0x29   : > { %553 = vmatprep.subr.bf16.mxu0 %v1445_v10  ;;  %v1450_v13 = vld [vmem:[%s284_s23 + $0x28] ss:$16 sps:$4 sm:$0xff]   ;;  %666 = vmatprep.subr.bf16.mxu1 %v1447_v11  ;;  %v1451_v14 = vld [vmem:[%s284_s23 + $0x4] ss:$16 sps:$4 sm:$0xff]   ;;  %v1453_v15 = vld [vmem:[%s284_s23 + $0xc] ss:$16 sps:$4 sm:$0xff]  }
  0x2a   : > { %554 = vmatpush1.bf16.msra.mxu0 %v1449_v12  ;;  %667 = vmatpush1.bf16.msra.mxu1 %v1450_v13  ;;  %v1455_v16 = vld [vmem:[%s284_s23] ss:$16 sps:$4 sm:$0xff]   ;;  %v1456_v17 = vld [vmem:[%s284_s23 + $0x8] ss:$16 sps:$4 sm:$0xff]   ;;  %v1138_v48 = vld [vmem:[#allocation2] sm:$0x1] }
  0x2b   : > { %555 = vmatprep.subr.bf16.mxu0 %v1451_v14  ;;  %668 = vmatprep.subr.bf16.mxu1 %v1453_v15  ;;  %v349_v27 = vld [vmem:[%s2089_s2 + $0x48] sm:$0xff]  ;;  %v346_v28 = vld [vmem:[%s2089_s2 + $0x30] sm:$0xff]  ;;  %v347_v30 = vld [vmem:[%s2089_s2 + $0x38] sm:$0xff]  ;;  %s312_s15 = scalar_lea.vmem [#allocation4], %s1356_s10  ;;  %s1269_s20 = scalar_lea.sflag [#allocation5], %s1634_s21 }
  0x2c   : > { %433 = vperm.xlu0 %1443, %v355_v21   ;;  %423 = vperm.xlu1 %1444, %v353_v22   ;;  %v1459_v29 = vld [vmem:[%s2088_s1 + $0x10] sm:$0xff]   ;;  %v344_v31 = vld [vmem:[%s2089_s2 + $0x20] sm:$0xff]  ;;  %v345_v32 = vld [vmem:[%s2089_s2 + $0x28] sm:$0xff]  ;;  %s1283_s16 = sshll.u32 %s312_s15, 4  ;;  %s1533_s23 = smov [#allocation4]   ;;  %s1284_s16 = int_to_ptr.vmem [resolvable:$true] %s1283_s16 }
  0x2d   : > { %v342_v33 = vld [vmem:[%s2089_s2 + $0x10] sm:$0xff]  ;;  %v1460_v34 = vld [vmem:[%s2088_s1 + $0x18] sm:$0xff]   ;;  %v340_v36 = vld [vmem:[%s2089_s2] sm:$0xff]  ;;  %s1469_s22 = scalar_lea.vmem %s1284_s16, 64  ;;  %s1473_s24 = sshll.u32 %s1533_s23, 4  ;;  %s1474_s24 = int_to_ptr.vmem [resolvable:$false] %s1473_s24 }
  0x2e   : > { %556 = vmatpush1.bf16.msra.mxu0 %v1455_v16  ;;  %669 = vmatpush1.bf16.msra.mxu1 %v1456_v17  ;;  %v343_v35 = vld [vmem:[%s2089_s2 + $0x18] sm:$0xff]  ;;  %v341_v37 = vld [vmem:[%s2089_s2 + $0x8] sm:$0xff]  ;;  %v877_v38 = vld [vmem:[%s2091_s4 + $0x30] sm:$0xff]  ;;  %p1470_p13 = scmp.ne.s32.totalorder %s1284_s16, %s1469_s22  ;;  %s1475_s6 = scalar_lea.vmem %s1474_s24, 128 }
  0x2f   : > { %v1461_v39 = vld [vmem:[%s2088_s1 + $0x20] sm:$0xff]   ;;  %v878_v40 = vld [vmem:[%s2091_s4 + $0x38] sm:$0xff]  ;;  %v876_v42 = vld [vmem:[%s2091_s4 + $0x28] sm:$0xff]  ;;  %p1476_p2 = scmp.lt.s32.totalorder %s1284_s16, %s1474_s24  ;;  %p1477_p3 = scmp.lt.s32.totalorder %s1475_s6, %s1469_s22 }
  0x30   : > { %408 = vperm.xlu0 %1443, %v350_v23   ;;  %413 = vperm.xlu1 %1444, %v351_v25   ;;  %v875_v41 = vld [vmem:[%s2091_s4 + $0x20] sm:$0xff]  ;;  %v873_v43 = vld [vmem:[%s2091_s4 + $0x10] sm:$0xff]  ;;  %v1462_v44 = vld [vmem:[%s2088_s1 + $0x28] sm:$0xff]   ;;  %p1471_p0 = pnand %p1470_p13, %p1615_p6 }
  0x31   : > { %1373 = vmatmul.mubr.msk.bf16.vlgmr.msra.gmra.mxu0 %vm516_vm0, %v1457_v18  ;;  %1381 = vmatmul.mubr.msk.bf16.vlgmr.msra.gmra.mxu1 %vm516_vm0, %v1457_v18  ;;  %v874_v45 = vld [vmem:[%s2091_s4 + $0x18] sm:$0xff]  ;;  %v871_v46 = vld [vmem:[%s2091_s4] sm:$0xff]  ;;  %v872_v47 = vld [vmem:[%s2091_s4 + $0x8] sm:$0xff]  ;;  %p1478_p4 = por %p1477_p3, %p1476_p2 }
  0x32   : > { %583 = vmatprep.mubr.bf16.mxu0 %v2095_v9  ;;  %696 = vmatprep.mubr.bf16.mxu1 %v2095_v9  ;;  %v1463_v49 = vld [vmem:[%s2088_s1 + $0x30] sm:$0xff]   ;;  %v1464_v50 = vld [vmem:[%s2088_s1 + $0x38] sm:$0xff]   ;;  %p1472_p1 = pneg %p1471_p0 }
  0x34   : > { %398 = vperm.xlu0 %1443, %v348_v26   ;;  %403 = vperm.xlu1 %1444, %v349_v27   ;;  %p1479_p5 = pnand %p1478_p4, %p1472_p1 }
  0x38   : > { %388 = vperm.xlu0 %1443, %v346_v28   ;;  %393 = vperm.xlu1 %1444, %v347_v30  }
  0x39   : > { %1374 = vmatmul.mubr.msk.bf16.gmra.mxu0 %vm516_vm0, %v1458_v24  ;;  %1382 = vmatmul.mubr.msk.bf16.gmra.mxu1 %vm516_vm0, %v1458_v24 }
  0x3a   : > { %593 = vmatprep.mubr.bf16.mxu0 %v2095_v9  ;;  %706 = vmatprep.mubr.bf16.mxu1 %v2095_v9 }
  0x3c   : > { %378 = vperm.xlu0 %1443, %v344_v31   ;;  %383 = vperm.xlu1 %1444, %v345_v32  }
  0x40   : > { %368 = vperm.xlu0 %1443, %v342_v33   ;;  %373 = vperm.xlu1 %1444, %v343_v35  }
  0x41   : > { %1375 = vmatmul.mubr.msk.bf16.gmra.mxu0 %vm516_vm0, %v1459_v29  ;;  %1383 = vmatmul.mubr.msk.bf16.gmra.mxu1 %vm516_vm0, %v1459_v29 }
  0x42   : > { %603 = vmatprep.mubr.bf16.mxu0 %v2095_v9  ;;  %716 = vmatprep.mubr.bf16.mxu1 %v2095_v9 }
  0x44   : > { %358 = vperm.xlu0 %1443, %v340_v36   ;;  %363 = vperm.xlu1 %1444, %v341_v37  }
  0x48   : > { %911 = vperm.xlu0 %1443, %v877_v38   ;;  %916 = vperm.xlu1 %1444, %v878_v40  }
  0x49   : > { %1376 = vmatmul.mubr.msk.bf16.gmra.mxu0 %vm516_vm0, %v1460_v34  ;;  %1384 = vmatmul.mubr.msk.bf16.gmra.mxu1 %vm516_vm0, %v1460_v34 }
  0x4a   : > { %613 = vmatprep.mubr.bf16.mxu0 %v2095_v9  ;;  %726 = vmatprep.mubr.bf16.mxu1 %v2095_v9 }
  0x4c   : > { %901 = vperm.xlu0 %1443, %v875_v41   ;;  %906 = vperm.xlu1 %1444, %v876_v42  }
  0x50   : > { %891 = vperm.xlu0 %1443, %v873_v43   ;;  %896 = vperm.xlu1 %1444, %v874_v45  }
  0x51   : > { %1377 = vmatmul.mubr.msk.bf16.gmra.mxu0 %vm516_vm0, %v1461_v39  ;;  %1385 = vmatmul.mubr.msk.bf16.gmra.mxu1 %vm516_vm0, %v1461_v39 }
  0x52   : > { %623 = vmatprep.mubr.bf16.mxu0 %v2095_v9  ;;  %736 = vmatprep.mubr.bf16.mxu1 %v2095_v9 }
  0x54   : > { %881 = vperm.xlu0 %1443, %v871_v46   ;;  %886 = vperm.xlu1 %1444, %v872_v47  }
  0x58   : > { %1141 = vperm.xlu0 %1443, %v1138_v48  }
  0x59   : > { %1378 = vmatmul.mubr.msk.bf16.gmra.mxu0 %vm516_vm0, %v1462_v44  ;;  %1386 = vmatmul.mubr.msk.bf16.gmra.mxu1 %vm516_vm0, %v1462_v44 }
  0x5a   : > { %633 = vmatprep.mubr.bf16.mxu0 %v2095_v9  ;;  %746 = vmatprep.mubr.bf16.mxu1 %v2095_v9 }
  0x61   : > { %1379 = vmatmul.mubr.msk.bf16.gmra.mxu0 %vm516_vm0, %v1463_v49  ;;  %1387 = vmatmul.mubr.msk.bf16.gmra.mxu1 %vm516_vm0, %v1463_v49 }
  0x62   : > { %643 = vmatprep.mubr.bf16.mxu0 %v2095_v9  ;;  %756 = vmatprep.mubr.bf16.mxu1 %v2095_v9 }
  0x69   : > { %1380 = vmatmul.mubr.msk.bf16.gmra.mxu0 %vm516_vm0, %v1464_v50  ;;  %1388 = vmatmul.mubr.msk.bf16.gmra.mxu1 %vm516_vm0, %v1464_v50 }
  0x6a   : > { %975 = vmatprep.mubr.bf16.mxu0 %v2095_v9  ;;  %1048 = vmatprep.mubr.bf16.mxu1 %v2095_v9 }
  0xa3   : > { %v1769_v51 = vpop.permute.xlu0 %428  ;;  %v1771_v52 = vpop.permute.xlu1 %418 }
  0xa7   : > { %v1773_v53 = vpop.permute.xlu0 %433  ;;  %v1775_v54 = vpop.permute.xlu1 %423 }
  0xab   : > { %v1777_v55 = vpop.permute.xlu0 %408  ;;  %v1779_v56 = vpop.permute.xlu1 %413 }
  0xaf   : > { %v1781_v57 = vpop.permute.xlu0 %398  ;;  %v1783_v58 = vpop.permute.xlu1 %403 }
  0xb3   : > { %v1785_v59 = vpop.permute.xlu0 %388  ;;  %v1787_v60 = vpop.permute.xlu1 %393 }
  0xb7   : > { %v1789_v61 = vpop.permute.xlu0 %378  ;;  %v1791_v62 = vpop.permute.xlu1 %383 }
  0xb8   : > { %2102 = vst [vmem:[#allocation7_spill] sm:$0xff] %v1789_v61 }
  0xbb   : > { %v369_v63 = vpop.permute.xlu0 %368  ;;  %v374_v0 = vpop.permute.xlu1 %373 }
  0xbf   : > { %v359_v1 = vpop.permute.xlu0 %358  ;;  %v364_v4 = vpop.permute.xlu1 %363 }
  0xf1   : > { %v575_v2 = vpop.f32.mrf.mxu0  ;;  %v688_v3 = vpop.f32.mrf.mxu1 }
  0xf2   : > { %v576_v5 = vadd.f32 %v575_v2, %v359_v1  ;;  %v689_v6 = vadd.f32 %v688_v3, %v359_v1 }
  0xf3   : > { %v577_v7 = vpop.f32.mrf.mxu0  ;;  %v690_v8 = vpop.f32.mrf.mxu1 }
  0xf4   : > { %v578_v10 = vadd.f32 %v577_v7, %v359_v1  ;;  %v691_v11 = vadd.f32 %v690_v8, %v359_v1  ;;  %v767_v16 = vmax.f32 %v576_v5, 0.0  ;;  %v769_v17 = vmax.f32 %v689_v6, 0.0 }
  0xf5   : > { %v579_v12 = vpop.f32.mrf.mxu0  ;;  %v692_v13 = vpop.f32.mrf.mxu1 }
  0xf6   : > { %v580_v14 = vadd.f32 %v579_v12, %v364_v4  ;;  %v693_v15 = vadd.f32 %v692_v13, %v364_v4  ;;  %v768_v24 = vmax.f32 %v578_v10, 0.0  ;;  %v770_v25 = vmax.f32 %v691_v11, 0.0 }
  0xf7   : > { %v581_v18 = vpop.f32.mrf.mxu0  ;;  %v694_v19 = vpop.f32.mrf.mxu1 }
  0xf8   : > { %v771_v20 = vmax.f32 %v580_v14, 0.0  ;;  %v773_v21 = vmax.f32 %v693_v15, 0.0  ;;  %v582_v22 = vadd.f32 %v581_v18, %v364_v4  ;;  %v695_v23 = vadd.f32 %v694_v19, %v364_v4 }
  0xf9   : > { %v585_v26 = vpop.f32.mrf.mxu0  ;;  %v698_v27 = vpop.f32.mrf.mxu1 }
  0xfa   : > { %v1793_v28 = vpack.c.bf16 %v771_v20, %v767_v16  ;;  %v1795_v29 = vpack.c.bf16 %v773_v21, %v769_v17  ;;  %v772_v30 = vmax.f32 %v582_v22, 0.0  ;;  %v774_v31 = vmax.f32 %v695_v23, 0.0 }
  0xfb   : > { %v586_v32 = vadd.f32 %v585_v26, %v369_v63  ;;  %v699_v33 = vadd.f32 %v698_v27, %v369_v63  ;;  %v587_v34 = vpop.f32.mrf.mxu0  ;;  %v700_v35 = vpop.f32.mrf.mxu1 }
  0xfc   : > { %2103 = vst [vmem:[#allocation8_spill] sm:$0xff] %v1793_v28  ;;  %2104 = vst [vmem:[#allocation9_spill] sm:$0xff] %v1795_v29  ;;  %v1797_v36 = vpack.c.bf16 %v772_v30, %v768_v24  ;;  %v1799_v37 = vpack.c.bf16 %v774_v31, %v770_v25  ;;  %v588_v38 = vadd.f32 %v587_v34, %v369_v63 }
  0xfd   : > { %v701_v39 = vadd.f32 %v700_v35, %v369_v63  ;;  %v589_v40 = vpop.f32.mrf.mxu0  ;;  %v702_v41 = vpop.f32.mrf.mxu1  ;;  %v775_v44 = vmax.f32 %v586_v32, 0.0  ;;  %v777_v45 = vmax.f32 %v699_v33, 0.0 }
  0xfe   : > { %2105 = vst [vmem:[#allocation10_spill] sm:$0xff] %v1797_v36  ;;  %2106 = vst [vmem:[#allocation11_spill] sm:$0xff] %v1799_v37  ;;  %v590_v42 = vadd.f32 %v589_v40, %v374_v0  ;;  %v703_v43 = vadd.f32 %v702_v41, %v374_v0  ;;  %v776_v2 = vmax.f32 %v588_v38, 0.0 }
  0xff   : > { %v591_v46 = vpop.f32.mrf.mxu0  ;;  %v704_v47 = vpop.f32.mrf.mxu1  ;;  %v778_v3 = vmax.f32 %v701_v39, 0.0 }
 0x100   : > { %v779_v48 = vmax.f32 %v590_v42, 0.0  ;;  %v781_v49 = vmax.f32 %v703_v43, 0.0  ;;  %v592_v50 = vadd.f32 %v591_v46, %v374_v0  ;;  %v705_v1 = vadd.f32 %v704_v47, %v374_v0 }
 0x101   : > { %v1801_v4 = vpop.f32.mrf.mxu0  ;;  %v1803_v5 = vpop.f32.mrf.mxu1 }
 0x102   : > { %2107 = vst [vmem:[#allocation12_spill] sm:$0xff] %v1801_v4  ;;  %2108 = vst [vmem:[#allocation13_spill] sm:$0xff] %v1803_v5  ;;  %v1805_v6 = vpack.c.bf16 %v779_v48, %v775_v44  ;;  %v1807_v63 = vpack.c.bf16 %v781_v49, %v777_v45  ;;  %v780_v7 = vmax.f32 %v592_v50, 0.0  ;;  %v782_v8 = vmax.f32 %v705_v1, 0.0 }
 0x103   : > { %v597_v10 = vpop.f32.mrf.mxu0  ;;  %v710_v11 = vpop.f32.mrf.mxu1 }
 0x104   : > { %2109 = vst [vmem:[#allocation14_spill] sm:$0xff] %v1805_v6  ;;  %2110 = vst [vmem:[#allocation15_spill] sm:$0xff] %v1807_v63  ;;  %v1809_v12 = vpack.c.bf16 %v780_v7, %v776_v2  ;;  %v1811_v13 = vpack.c.bf16 %v782_v8, %v778_v3  ;;  %v1838_v3 = vadd.f32 %v597_v10, %v1789_v61 }
 0x105   : > { %v1813_v14 = vpop.f32.mrf.mxu0  ;;  %v1815_v0 = vpop.f32.mrf.mxu1  ;;  %v1841_v7 = vadd.f32 %v710_v11, %v1789_v61 }
 0x106   : > { %2111 = vst [vmem:[#allocation16_spill] sm:$0xff] %v1809_v12  ;;  %2112 = vst [vmem:[#allocation17_spill] sm:$0xff] %v1811_v13 }
 0x107   : > { %2113 = vst [vmem:[#allocation18_spill] sm:$0xff] %v1813_v14  ;;  %2114 = vst [vmem:[#allocation19_spill] sm:$0xff] %v1815_v0  ;;  %v601_v15 = vpop.f32.mrf.mxu0  ;;  %v714_v16 = vpop.f32.mrf.mxu1 }
 0x108   : > { %2115 = vst [vmem:[#allocation20_spill] sm:$0xff] %v1838_v3  ;;  %2116 = vst [vmem:[#allocation21_spill] sm:$0xff] %v1841_v7  ;;  %v1844_v8 = vadd.f32 %v601_v15, %v1791_v62  ;;  %v1847_v9 = vadd.f32 %v714_v16, %v1791_v62 }
 0x109   : > { %v1817_v17 = vpop.f32.mrf.mxu0  ;;  %v1819_v18 = vpop.f32.mrf.mxu1 }
 0x10a   : > { %2117 = vst [vmem:[#allocation22_spill] sm:$0xff] %v1844_v8  ;;  %2118 = vst [vmem:[#allocation23_spill] sm:$0xff] %v1847_v9 }
 0x10b   : > { %v607_v19 = vpop.f32.mrf.mxu0  ;;  %v720_v20 = vpop.f32.mrf.mxu1 }
 0x10c   : > { %v1850_v37 = vadd.f32 %v607_v19, %v1785_v59  ;;  %v1853_v36 = vadd.f32 %v720_v20, %v1785_v59 }
 0x10d   : > { %v1821_v21 = vpop.f32.mrf.mxu0  ;;  %v1823_v22 = vpop.f32.mrf.mxu1 }
 0x10e   : > { %2119 = vst [vmem:[#allocation24_spill] sm:$0xff] %v1850_v37  ;;  %2120 = vst [vmem:[#allocation25_spill] sm:$0xff] %v1853_v36 }
 0x10f   : > { %v611_v23 = vpop.f32.mrf.mxu0  ;;  %v724_v24 = vpop.f32.mrf.mxu1 }
 0x110   : > { %v1856_v10 = vadd.f32 %v611_v23, %v1787_v60  ;;  %v1859_v11 = vadd.f32 %v724_v24, %v1787_v60 }
 0x111   : > { %v1825_v25 = vpop.f32.mrf.mxu0  ;;  %v1827_v26 = vpop.f32.mrf.mxu1 }
 0x113   : > { %v617_v27 = vpop.f32.mrf.mxu0  ;;  %v730_v30 = vpop.f32.mrf.mxu1 }
 0x114   : > { %v1862_v15 = vadd.f32 %v617_v27, %v1781_v57  ;;  %v1865_v16 = vadd.f32 %v730_v30, %v1781_v57 }
 0x115   : > { %v1829_v31 = vpop.f32.mrf.mxu0  ;;  %v1831_v32 = vpop.f32.mrf.mxu1 }
 0x117   : > { %v621_v33 = vpop.f32.mrf.mxu0  ;;  %v734_v34 = vpop.f32.mrf.mxu1 }
 0x118   : > { %v1868_v63 = vadd.f32 %v621_v33, %v1783_v58  ;;  %v1871_v19 = vadd.f32 %v734_v34, %v1783_v58 }
 0x119   : > { %v1833_v35 = vpop.f32.mrf.mxu0  ;;  %v1835_v38 = vpop.f32.mrf.mxu1 }
 0x11b   : > { %v627_v39 = vpop.f32.mrf.mxu0  ;;  %v740_v40 = vpop.f32.mrf.mxu1 }
 0x11c   : > { %v1874_v23 = vadd.f32 %v627_v39, %v1777_v55  ;;  %v1877_v24 = vadd.f32 %v740_v40, %v1777_v55 }
 0x11d   : > { %v629_v41 = vpop.f32.mrf.mxu0  ;;  %v742_v42 = vpop.f32.mrf.mxu1 }
 0x11e   : > { %v1880_v27 = vadd.f32 %v629_v41, %v1779_v56  ;;  %v1883_v30 = vadd.f32 %v742_v42, %v1779_v56 }
 0x11f   : > { %v631_v43 = vpop.f32.mrf.mxu0  ;;  %v744_v44 = vpop.f32.mrf.mxu1 }
 0x120   : > { %v1886_v33 = vadd.f32 %v631_v43, %v1779_v56  ;;  %v1889_v34 = vadd.f32 %v744_v44, %v1779_v56 }
 0x121   : > { %v635_v45 = vpop.f32.mrf.mxu0  ;;  %v748_v46 = vpop.f32.mrf.mxu1 }
 0x123   : > { %v637_v47 = vpop.f32.mrf.mxu0  ;;  %v750_v48 = vpop.f32.mrf.mxu1 }
 0x124   : > { %v638_v43 = vadd.f32 %v637_v47, %v1771_v52  ;;  %v751_v5 = vadd.f32 %v750_v48, %v1771_v52 }
 0x125   : > { %v639_v49 = vpop.f32.mrf.mxu0  ;;  %v752_v50 = vpop.f32.mrf.mxu1 }
 0x126   : > { %v640_v4 = vadd.f32 %v639_v49, %v1775_v54  ;;  %v816_v0 = vmax.f32 %v638_v43, 0.0  ;;  %v798_v43 = vmax.f32 %v1859_v11, 0.0 }
 0x127   : > { %v641_v1 = vpop.f32.mrf.mxu0  ;;  %v754_v2 = vpop.f32.mrf.mxu1 }
 0x128   : > { %v642_v13 = vadd.f32 %v641_v1, %v1775_v54  ;;  %v755_v39 = vadd.f32 %v754_v2, %v1775_v54  ;;  %v819_v14 = vmax.f32 %v640_v4, 0.0  ;;  %v810_v4 = vmax.f32 %v1877_v24, 0.0 }
 0x129   : > { %v645_v29 = vpop.f32.mrf.mxu0  ;;  %v758_v28 = vpop.f32.mrf.mxu1 }
 0x12a   : > { %v646_v56 = vadd.f32 %v645_v29, %v1769_v51  ;;  %v759_v44 = vadd.f32 %v758_v28, %v1769_v51  ;;  %v820_v61 = vmax.f32 %v642_v13, 0.0  ;;  %v749_v28 = vadd.f32 %v748_v46, %v1771_v52 }
 0x12b   : > { %v647_v20 = vpop.f32.mrf.mxu0  ;;  %v760_v6 = vpop.f32.mrf.mxu1  ;;  %v804_v46 = vmax.f32 %v1868_v63, 0.0  ;;  %v723_v63 = vadd.f32 %v1823_v22, %v1787_v60 }
 0x12c   : > { %v648_v40 = vadd.f32 %v647_v20, %v1769_v51  ;;  %v761_v41 = vadd.f32 %v760_v6, %v1769_v51  ;;  %v753_v20 = vadd.f32 %v752_v50, %v1775_v54  ;;  %v636_v51 = vadd.f32 %v635_v45, %v1771_v52 }
 0x12d   : > { %v649_v12 = vpop.f32.mrf.mxu0  ;;  %v762_v7 = vpop.f32.mrf.mxu1  ;;  %v823_v37 = vmax.f32 %v646_v56, 0.0  ;;  %v825_v49 = vmax.f32 %v759_v44, 0.0  ;;  %v818_v54 = vmax.f32 %v751_v5, 0.0  ;;  %v626_v52 = vadd.f32 %v1833_v35, %v1777_v55 }
 0x12e   : > { %v650_v3 = vadd.f32 %v649_v12, %v1773_v53  ;;  %v763_v42 = vadd.f32 %v762_v7, %v1773_v53  ;;  %v822_v7 = vmax.f32 %v755_v39, 0.0  ;;  %v824_v8 = vmax.f32 %v648_v40, 0.0 }
 0x12f   : > { %v651_v1 = vpop.f32.mrf.mxu0  ;;  %v764_v2 = vpop.f32.mrf.mxu1  ;;  %v826_v48 = vmax.f32 %v761_v41, 0.0  ;;  %v814_v40 = vmax.f32 %v1889_v34, 0.0  ;;  %v856_v41 = vpack.c.bf16 %v820_v61, %v816_v0  ;;  %v739_v5 = vadd.f32 %v1835_v38, %v1777_v55 }
 0x130   : > { %v652_v6 = vadd.f32 %v651_v1, %v1773_v53  ;;  %v765_v12 = vadd.f32 %v764_v2, %v1773_v53  ;;  %v827_v9 = vmax.f32 %v650_v3, 0.0  ;;  %v829_v47 = vmax.f32 %v763_v42, 0.0 }
 0x131   : > { %v821_v53 = vmax.f32 %v753_v20, 0.0  ;;  %v812_v3 = vmax.f32 %v1886_v33, 0.0  ;;  %v858_v42 = vpack.c.bf16 %v822_v7, %v818_v54  ;;  %v817_v45 = vmax.f32 %v749_v28, 0.0  ;;  %v2122_v20 = vld [vmem:[#allocation19_spill] sm:$0xff] }
 0x132   : > { %v828_v36 = vmax.f32 %v652_v6, 0.0  ;;  %v830_v29 = vmax.f32 %v765_v12, 0.0  ;;  %v859_v13 = vpack.c.bf16 %v827_v9, %v823_v37  ;;  %v861_v39 = vpack.c.bf16 %v829_v47, %v825_v49  ;;  %v2123_v6 = vld [vmem:[#allocation24_spill] sm:$0xff]  ;;  %v2124_v12 = vld [vmem:[#allocation25_spill] sm:$0xff] }
 0x133   : > { %v620_v9 = vadd.f32 %v1829_v31, %v1783_v58  ;;  %v733_v37 = vadd.f32 %v1831_v32, %v1783_v58  ;;  %v808_v61 = vmax.f32 %v1874_v23, 0.0  ;;  %v811_v0 = vmax.f32 %v1880_v27, 0.0 }
 0x134   : > { %v860_v50 = vpack.c.bf16 %v828_v36, %v824_v8  ;;  %v862_v1 = vpack.c.bf16 %v830_v29, %v826_v48  ;;  %v815_v36 = vmax.f32 %v636_v51, 0.0  ;;  %v813_v55 = vmax.f32 %v1883_v30, 0.0  ;;  %v2126_v51 = vld [vmem:[#allocation23_spill] sm:$0xff] }
 0x135   : > { %v857_v38 = vpack.c.bf16 %v821_v53, %v817_v45  ;;  %v806_v8 = vmax.f32 %v1871_v19, 0.0  ;;  %v852_v31 = vpack.c.bf16 %v812_v3, %v808_v61  ;;  %v854_v33 = vpack.c.bf16 %v814_v40, %v810_v4  ;;  %v2130_v40 = vld [vmem:[#allocation20_spill] sm:$0xff] }
 0x136   : > { %943 = vmatprep.subr.bf16.mxu0 %v860_v50  ;;  %1016 = vmatprep.subr.bf16.mxu1 %v862_v1  ;;  %v855_v35 = vpack.c.bf16 %v819_v14, %v815_v36  ;;  %v616_v58 = vadd.f32 %v1825_v25, %v1781_v57  ;;  %v729_v32 = vadd.f32 %v1827_v26, %v1781_v57  ;;  %v807_v23 = vmax.f32 %v626_v52, 0.0  ;;  %v2127_v50 = vld [vmem:[#allocation7_spill] sm:$0xff]  ;;  %v2128_v1 = vld [vmem:[#allocation12_spill] sm:$0xff] }
 0x137   : > { %944 = vmatpush1.bf16.msra.mxu0 %v859_v13  ;;  %1017 = vmatpush1.bf16.msra.mxu1 %v861_v39  ;;  %v809_v24 = vmax.f32 %v739_v5, 0.0  ;;  %v610_v14 = vadd.f32 %v1821_v21, %v1787_v60  ;;  %v800_v19 = vmax.f32 %v1862_v15, 0.0  ;;  %v802_v27 = vmax.f32 %v1865_v16, 0.0  ;;  %v2121_v16 = vld [vmem:[#allocation18_spill] sm:$0xff] }
 0x138   : > { %945 = vmatprep.subr.bf16.mxu0 %v856_v41  ;;  %1018 = vmatprep.subr.bf16.mxu1 %v858_v42  ;;  %v803_v25 = vmax.f32 %v620_v9, 0.0  ;;  %v805_v30 = vmax.f32 %v733_v37, 0.0  ;;  %v851_v34 = vpack.c.bf16 %v811_v0, %v807_v23  ;;  %v796_v26 = vmax.f32 %v1856_v10, 0.0  ;;  %v2131_v42 = vld [vmem:[#allocation21_spill] sm:$0xff]  ;;  %v2138_v23 = vld [vmem:[#allocation8_spill] sm:$0xff] }
 0x139   : > { %v853_v57 = vpack.c.bf16 %v813_v55, %v809_v24  ;;  %v848_v56 = vpack.c.bf16 %v804_v46, %v800_v19  ;;  %v850_v44 = vpack.c.bf16 %v806_v8, %v802_v27  ;;  %v606_v21 = vadd.f32 %v1817_v17, %v1785_v59  ;;  %v2133_v46 = vld [vmem:[#allocation17_spill] sm:$0xff]  ;;  %v2134_v8 = vld [vmem:[#allocation14_spill] sm:$0xff]  ;;  %v1467_v19 = vld [vmem:[%s2090_s3 + $0x10] sm:$0xff]  }
 0x13a   : > { %v719_v60 = vadd.f32 %v1819_v18, %v1785_v59  ;;  %v799_v22 = vmax.f32 %v616_v58, 0.0  ;;  %v801_v15 = vmax.f32 %v729_v32, 0.0  ;;  %v600_v2 = vadd.f32 %v2121_v16, %v1791_v62  ;;  %v2125_v18 = vld [vmem:[#allocation22_spill] sm:$0xff]  ;;  %v2137_v58 = vld [vmem:[#allocation11_spill] sm:$0xff]  ;;  %v2139_v24 = vld [vmem:[#allocation9_spill] sm:$0xff] }
 0x13b   : > { %946 = vmatpush1.bf16.msra.mxu0 %v855_v35  ;;  %1019 = vmatpush1.bf16.msra.mxu1 %v857_v38  ;;  %v713_v10 = vadd.f32 %v2122_v20, %v1791_v62  ;;  %v792_v11 = vmax.f32 %v2123_v6, 0.0  ;;  %v794_v7 = vmax.f32 %v2124_v12, 0.0  ;;  %v795_v17 = vmax.f32 %v610_v14, 0.0  ;;  %v2129_v62 = vld [vmem:[#allocation13_spill] sm:$0xff]  ;;  %v2132_v38 = vld [vmem:[#allocation16_spill] sm:$0xff] }
 0x13c   : > { %947 = vmatprep.subr.bf16.mxu0 %v852_v31  ;;  %1020 = vmatprep.subr.bf16.mxu1 %v854_v33  ;;  %v797_v47 = vmax.f32 %v723_v63, 0.0  ;;  %v847_v48 = vpack.c.bf16 %v803_v25, %v799_v22  ;;  %v849_v59 = vpack.c.bf16 %v805_v30, %v801_v15  ;;  %v788_v29 = vmax.f32 %v2125_v18, 0.0  ;;  %v2135_v31 = vld [vmem:[#allocation15_spill] sm:$0xff]  ;;  %v2136_v33 = vld [vmem:[#allocation10_spill] sm:$0xff]  ;;  %v1468_v27 = vld [vmem:[%s2090_s3 + $0x18] sm:$0xff]  }
 0x13d   : > { %v790_v28 = vmax.f32 %v2126_v51, 0.0  ;;  %v844_v49 = vpack.c.bf16 %v796_v26, %v792_v11  ;;  %v846_v54 = vpack.c.bf16 %v798_v43, %v794_v7  ;;  %v596_v53 = vadd.f32 %v2128_v1, %v2127_v50  ;;  %v1465_v32 = vld [vmem:[%s2090_s3] sm:$0xff]   ;;  %v1466_v63 = vld [vmem:[%s2090_s3 + $0x8] sm:$0xff]  }
 0x13e   : > { %v709_v13 = vadd.f32 %v2129_v62, %v2127_v50  ;;  %v791_v39 = vmax.f32 %v606_v21, 0.0  ;;  %v793_v3 = vmax.f32 %v719_v60, 0.0  ;;  %v784_v41 = vmax.f32 %v2130_v40, 0.0  ;;  %v912_v21 = vpop.permute.xlu0 %911  ;;  %v917_v60 = vpop.permute.xlu1 %916 }
 0x13f   : > { %948 = vmatpush1.bf16.msra.mxu0 %v851_v34  ;;  %1021 = vmatpush1.bf16.msra.mxu1 %v853_v57  ;;  %v786_v52 = vmax.f32 %v2131_v42, 0.0  ;;  %v787_v5 = vmax.f32 %v600_v2, 0.0  ;;  %v789_v36 = vmax.f32 %v713_v10, 0.0  ;;  %v783_v4 = vmax.f32 %v596_v53, 0.0 }
 0x140   : > { %949 = vmatprep.subr.bf16.mxu0 %v848_v56  ;;  %1022 = vmatprep.subr.bf16.mxu1 %v850_v44  ;;  %v843_v45 = vpack.c.bf16 %v795_v17, %v791_v39  ;;  %v845_v9 = vpack.c.bf16 %v797_v47, %v793_v3  ;;  %v840_v37 = vpack.c.bf16 %v788_v29, %v784_v41  ;;  %v785_v0 = vmax.f32 %v709_v13, 0.0 }
 0x141   : > { %v842_v61 = vpack.c.bf16 %v790_v28, %v786_v52  ;;  %v839_v55 = vpack.c.bf16 %v787_v5, %v783_v4  ;;  %v2140_v14 = vmov 0  }
 0x142   : > { %v841_v35 = vpack.c.bf16 %v789_v36, %v785_v0  ;;  %v902_v6 = vpop.permute.xlu0 %901  ;;  %v907_v11 = vpop.permute.xlu1 %906 }
 0x143   : > { %950 = vmatpush1.bf16.msra.mxu0 %v847_v48  ;;  %1023 = vmatpush1.bf16.msra.mxu1 %v849_v59 }
 0x144   : > { %951 = vmatprep.subr.bf16.mxu0 %v844_v49  ;;  %1024 = vmatprep.subr.bf16.mxu1 %v846_v54 }
 0x146   : > { %v1993_v18 = vpop.permute.xlu0 %891  ;;  %v897_v29 = vpop.permute.xlu1 %896 }
 0x147   : > { %952 = vmatpush1.bf16.msra.mxu0 %v843_v45  ;;  %1025 = vmatpush1.bf16.msra.mxu1 %v845_v9 }
 0x148   : > { %953 = vmatprep.subr.bf16.mxu0 %v840_v37  ;;  %1026 = vmatprep.subr.bf16.mxu1 %v842_v61 }
 0x14a   : > { %v1995_v53 = vpop.permute.xlu0 %881  ;;  %v1997_v62 = vpop.permute.xlu1 %886 }
 0x14b   : > { %954 = vmatpush1.bf16.msra.mxu0 %v839_v55  ;;  %1027 = vmatpush1.bf16.msra.mxu1 %v841_v35 }
 0x14c   : > { %955 = vmatprep.subr.bf16.mxu0 %v2132_v38  ;;  %1028 = vmatprep.subr.bf16.mxu1 %v2133_v46 }
 0x14f   : > { %956 = vmatpush1.bf16.msra.mxu0 %v2134_v8  ;;  %1029 = vmatpush1.bf16.msra.mxu1 %v2135_v31 }
 0x150   : > { %957 = vmatprep.subr.bf16.mxu0 %v2136_v33  ;;  %1030 = vmatprep.subr.bf16.mxu1 %v2137_v58 }
 0x153   : > { %958 = vmatpush1.bf16.msra.mxu0 %v2138_v23  ;;  %1031 = vmatpush1.bf16.msra.mxu1 %v2139_v24 }
 0x156   : > { %976 = vmatmul.mubr.bf16.vlgmr.msra.gmra.mxu0 %v1465_v32  ;;  %1049 = vmatmul.mubr.bf16.vlgmr.msra.gmra.mxu1 %v1465_v32 }
 0x157   : > { %985 = vmatprep.mubr.bf16.mxu0 %v2140_v14  ;;  %1058 = vmatprep.mubr.bf16.mxu1 %v2140_v14 }
 0x15e   : > { %986 = vmatmul.mubr.bf16.gmra.mxu0 %v1466_v63  ;;  %1059 = vmatmul.mubr.bf16.gmra.mxu1 %v1466_v63 }
 0x15f   : > { %995 = vmatprep.mubr.bf16.mxu0 %v2140_v14  ;;  %1068 = vmatprep.mubr.bf16.mxu1 %v2140_v14 }
 0x166   : > { %996 = vmatmul.mubr.bf16.gmra.mxu0 %v1467_v19  ;;  %1069 = vmatmul.mubr.bf16.gmra.mxu1 %v1467_v19 }
 0x167   : > { %1005 = vmatprep.mubr.bf16.mxu0 %v2140_v14  ;;  %1078 = vmatprep.mubr.bf16.mxu1 %v2140_v14 }
 0x16e   : > { %1006 = vmatmul.mubr.bf16.gmra.mxu0 %v1468_v27  ;;  %1079 = vmatmul.mubr.bf16.gmra.mxu1 %v1468_v27 }
 0x16f   : > { %1184 = vmatprep.mubr.bf16.mxu0 %v2140_v14  ;;  %1225 = vmatprep.mubr.bf16.mxu1 %v2140_v14 }
 0x216   : > { %v1981_v25 = vpop.f32.mrf.mxu0  ;;  %v1983_v30 = vpop.f32.mrf.mxu1 }
 0x218   : > { %v979_v34 = vpop.f32.mrf.mxu0  ;;  %v1052_v57 = vpop.f32.mrf.mxu1 }
 0x219   : > { %v2000_v13 = vadd.f32 %v979_v34, %v1995_v53  ;;  %v2003_v39 = vadd.f32 %v1052_v57, %v1995_v53 }
 0x21a   : > { %v1985_v26 = vpop.f32.mrf.mxu0  ;;  %v1987_v43 = vpop.f32.mrf.mxu1 }
 0x21c   : > { %v983_v56 = vpop.f32.mrf.mxu0  ;;  %v1056_v44 = vpop.f32.mrf.mxu1 }
 0x21d   : > { %v2006_v3 = vadd.f32 %v983_v56, %v1997_v62  ;;  %v2009_v40 = vadd.f32 %v1056_v44, %v1997_v62 }
 0x21e   : > { %v1989_v22 = vpop.f32.mrf.mxu0  ;;  %v1991_v15 = vpop.f32.mrf.mxu1 }
 0x220   : > { %v989_v16 = vpop.f32.mrf.mxu0  ;;  %v1062_v2 = vpop.f32.mrf.mxu1 }
 0x221   : > { %v2012_v52 = vadd.f32 %v989_v16, %v1993_v18  ;;  %v2015_v5 = vadd.f32 %v1062_v2, %v1993_v18 }
 0x222   : > { %v991_v20 = vpop.f32.mrf.mxu0  ;;  %v1064_v10 = vpop.f32.mrf.mxu1 }
 0x223   : > { %v2017_v36 = vadd.f32 %v991_v20, %v897_v29  ;;  %v2019_v45 = vadd.f32 %v1064_v10, %v897_v29 }
 0x224   : > { %v993_v12 = vpop.f32.mrf.mxu0  ;;  %v1066_v7 = vpop.f32.mrf.mxu1 }
 0x225   : > { %v2021_v9 = vadd.f32 %v993_v12, %v897_v29  ;;  %v2023_v37 = vadd.f32 %v1066_v7, %v897_v29 }
 0x226   : > { %v997_v17 = vpop.f32.mrf.mxu0  ;;  %v1070_v47 = vpop.f32.mrf.mxu1 }
 0x227   : > { %v998_v12 = vadd.f32 %v997_v17, %v902_v6  ;;  %v1071_v7 = vadd.f32 %v1070_v47, %v902_v6  ;;  %v1061_v17 = vadd.f32 %v1991_v15, %v1993_v18  ;;  %v1103_v15 = vmax.f32 %v2019_v45, 0.0 }
 0x228   : > { %v999_v48 = vpop.f32.mrf.mxu0  ;;  %v1072_v59 = vpop.f32.mrf.mxu1  ;;  %v1092_v45 = vmax.f32 %v2003_v39, 0.0  ;;  %v1144_v39 = vlaneseq }
 0x229   : > { %v1000_v31 = vadd.f32 %v999_v48, %v902_v6  ;;  %v1073_v33 = vadd.f32 %v1072_v59, %v902_v6  ;;  %v988_v6 = vadd.f32 %v1989_v22, %v1993_v18  ;;  %v1105_v47 = vmax.f32 %v998_v12, 0.0 }
 0x22a   : > { %v1001_v51 = vpop.f32.mrf.mxu0  ;;  %v1074_v28 = vpop.f32.mrf.mxu1  ;;  %v1101_v22 = vmax.f32 %v2017_v36, 0.0  ;;  %v1090_v36 = vmax.f32 %v2000_v13, 0.0  ;;  %v1137_v13 = vld [vmem:[%s2092_s5] sm:$0x1]  ;;  %vm1265_vm2 = vcmp.lt.s32.totalorder %v1144_v39, 512 }
 0x22b   : > { %v1002_v14 = vadd.f32 %v1001_v51, %v907_v11  ;;  %v1075_v63 = vadd.f32 %v1074_v28, %v907_v11  ;;  %v1106_v29 = vmax.f32 %v1000_v31, 0.0 }
 0x22c   : > { %v1003_v49 = vpop.f32.mrf.mxu0  ;;  %v1076_v54 = vpop.f32.mrf.mxu1 }
 0x22d   : > { %v1004_v61 = vadd.f32 %v1003_v49, %v907_v11  ;;  %v1077_v4 = vadd.f32 %v1076_v54, %v907_v11  ;;  %v1109_v51 = vmax.f32 %v1002_v14, 0.0  ;;  %v1111_v11 = vmax.f32 %v1075_v63, 0.0 }
 0x22e   : > { %v1007_v50 = vpop.f32.mrf.mxu0  ;;  %v1080_v1 = vpop.f32.mrf.mxu1 }
 0x22f   : > { %v1008_v58 = vadd.f32 %v1007_v50, %v912_v21  ;;  %v1081_v32 = vadd.f32 %v1080_v1, %v912_v21  ;;  %v1110_v34 = vmax.f32 %v1004_v61, 0.0  ;;  %v1112_v57 = vmax.f32 %v1077_v4, 0.0 }
 0x230   : > { %v1009_v41 = vpop.f32.mrf.mxu0  ;;  %v1082_v42 = vpop.f32.mrf.mxu1  ;;  %v1102_v50 = vmax.f32 %v2021_v9, 0.0  ;;  %v1104_v1 = vmax.f32 %v2023_v37, 0.0  ;;  %v1107_v61 = vmax.f32 %v1071_v7, 0.0  ;;  %v982_v4 = vadd.f32 %v1985_v26, %v1997_v62 }
 0x231   : > { %v1010_v35 = vadd.f32 %v1009_v41, %v912_v21  ;;  %v1083_v38 = vadd.f32 %v1082_v42, %v912_v21  ;;  %v1113_v48 = vmax.f32 %v1008_v58, 0.0  ;;  %v1115_v59 = vmax.f32 %v1081_v32, 0.0 }
 0x232   : > { %v1011_v0 = vpop.f32.mrf.mxu0  ;;  %v1084_v55 = vpop.f32.mrf.mxu1  ;;  %v1108_v21 = vmax.f32 %v1073_v33, 0.0  ;;  %v1130_v41 = vpack.c.bf16 %v1110_v34, %v1106_v29  ;;  %v1055_v9 = vadd.f32 %v1987_v43, %v1997_v62  ;;  %v1098_v37 = vmax.f32 %v2012_v52, 0.0 }
 0x233   : > { %v1012_v46 = vadd.f32 %v1011_v0, %v917_v60  ;;  %v1085_v8 = vadd.f32 %v1084_v55, %v917_v60  ;;  %v1114_v16 = vmax.f32 %v1010_v35, 0.0  ;;  %v1116_v2 = vmax.f32 %v1083_v38, 0.0 }
 0x234   : > { %v1013_v23 = vpop.f32.mrf.mxu0  ;;  %v1086_v24 = vpop.f32.mrf.mxu1  ;;  %v1132_v42 = vpack.c.bf16 %v1112_v57, %v1108_v21  ;;  %v1100_v0 = vmax.f32 %v2015_v5, 0.0  ;;  %v1129_v18 = vpack.c.bf16 %v1109_v51, %v1105_v47  ;;  %v1131_v55 = vpack.c.bf16 %v1111_v11, %v1107_v61 }
 0x235   : > { %v1014_v19 = vadd.f32 %v1013_v23, %v917_v60  ;;  %v1087_v27 = vadd.f32 %v1086_v24, %v917_v60  ;;  %v1117_v56 = vmax.f32 %v1012_v46, 0.0  ;;  %v1119_v44 = vmax.f32 %v1085_v8, 0.0 }
 0x236   : > { %v1094_v35 = vmax.f32 %v2006_v3, 0.0  ;;  %v1096_v38 = vmax.f32 %v2009_v40, 0.0  ;;  %v1126_v26 = vpack.c.bf16 %v1102_v50, %v1098_v37  ;;  %v1128_v46 = vpack.c.bf16 %v1104_v1, %v1100_v0 }
 0x237   : > { %v1118_v20 = vmax.f32 %v1014_v19, 0.0  ;;  %v1120_v10 = vmax.f32 %v1087_v27, 0.0  ;;  %v1133_v28 = vpack.c.bf16 %v1117_v56, %v1113_v48  ;;  %v1135_v60 = vpack.c.bf16 %v1119_v44, %v1115_v59  ;;  %v1142_v27 = vpop.permute.xlu0 %1141 }
 0x238   : > { %v978_v43 = vadd.f32 %v1981_v25, %v1995_v53  ;;  %v1051_v62 = vadd.f32 %v1983_v30, %v1995_v53  ;;  %v1097_v52 = vmax.f32 %v988_v6, 0.0  ;;  %v1099_v5 = vmax.f32 %v1061_v17, 0.0 }
 0x239   : > { %v1134_v49 = vpack.c.bf16 %v1118_v20, %v1114_v16  ;;  %v1136_v54 = vpack.c.bf16 %v1120_v10, %v1116_v2  ;;  %v1093_v3 = vmax.f32 %v982_v4, 0.0  ;;  %v1095_v40 = vmax.f32 %v1055_v9, 0.0 }
 0x23a   : > { %v1125_v8 = vpack.c.bf16 %v1101_v22, %v1097_v52  ;;  %v1127_v31 = vpack.c.bf16 %v1103_v15, %v1099_v5  ;;  %v1122_v33 = vpack.c.bf16 %v1094_v35, %v1090_v36  ;;  %v1124_v58 = vpack.c.bf16 %v1096_v38, %v1092_v45 }
 0x23b   : > { %1160 = vmatprep.subr.bf16.mxu0 %v1134_v49  ;;  %1201 = vmatprep.subr.bf16.mxu1 %v1136_v54  ;;  %v1089_v25 = vmax.f32 %v978_v43, 0.0  ;;  %v1091_v32 = vmax.f32 %v1051_v62, 0.0  ;;  %v1145_v23 = vshrl.u32 %v1144_v39, 7  ;;  %v1532_v24 = vmov 1966171168  }
 0x23c   : > { %1161 = vmatpush1.bf16.msra.mxu0 %v1133_v28  ;;  %1202 = vmatpush1.bf16.msra.mxu1 %v1135_v60  ;;  %v1241_v14 = vunpack.c.l.s4 %v1532_v24 }
 0x23d   : > { %1162 = vmatprep.subr.bf16.mxu0 %v1130_v41  ;;  %1203 = vmatprep.subr.bf16.mxu1 %v1132_v42  ;;  %v1121_v30 = vpack.c.bf16 %v1093_v3, %v1089_v25  ;;  %v1123_v53 = vpack.c.bf16 %v1095_v40, %v1091_v32  ;;  %v1146_v63 = vsub.s32 0, %v1145_v23 }
 0x23e   : > { %v1242_v19 = vunpack.c.0.s8 %v1241_v14 }
 0x23f   : > { %v1147_v56 = vrot.slane %v1142_v27, %v1146_v63 }
 0x240   : > { %1163 = vmatpush1.bf16.msra.mxu0 %v1129_v18  ;;  %1204 = vmatpush1.bf16.msra.mxu1 %v1131_v55  ;;  %v1245_v44 = vsub.s32 %v1242_v19, %v1145_v23 }
 0x241   : > { %1164 = vmatprep.subr.bf16.mxu0 %v1126_v26  ;;  %1205 = vmatprep.subr.bf16.mxu1 %v1128_v46 }
 0x244   : > { %1165 = vmatpush1.bf16.msra.mxu0 %v1125_v8  ;;  %1206 = vmatpush1.bf16.msra.mxu1 %v1127_v31 }
 0x245   : > { %1166 = vmatprep.subr.bf16.mxu0 %v1122_v33  ;;  %1207 = vmatprep.subr.bf16.mxu1 %v1124_v58 }
 0x248   : > { %1167 = vmatpush1.bf16.msra.mxu0 %v1121_v30  ;;  %1208 = vmatpush1.bf16.msra.mxu1 %v1123_v53 }
 0x24b   : > { %1393 = vmatmul.mubr.msk.bf16.vlgmr.msra.gmra.mxu0 %vm1148_vm1, %v1137_v13  ;;  %1394 = vmatmul.mubr.msk.bf16.vlgmr.msra.gmra.mxu1 %vm1148_vm1, %v1137_v13 }
 0x30b   : > { %v1186_v34 = vpop.f32.mrf.mxu0  ;;  %v1227_v57 = vpop.f32.mrf.mxu1 }
 0x30c   : > { %v1187_v20 = vadd.f32 %v1186_v34, %v1147_v56  ;;  %v1228_v10 = vadd.f32 %v1227_v57, %v1147_v56 }
 0x30d   : > { %v1188_v16 = vpop.f32.mrf.mxu0  ;;  %v1229_v2 = vpop.f32.mrf.mxu1 }
 0x30e   : > { %v1189_v12 = vadd.f32 %v1188_v16, %v1147_v56  ;;  %v1230_v7 = vadd.f32 %v1229_v2, %v1147_v56 }
 0x30f   : > { %v1190_v48 = vpop.f32.mrf.mxu0  ;;  %v1231_v59 = vpop.f32.mrf.mxu1 }
 0x310   : > { %v1238_v29 = vcombine.low %v1187_v20, %v1189_v12  ;;  %v1239_v21 = vcombine.low %v1228_v10, %v1230_v7 }
 0x311   : > { %v1191_v49 = vpop.f32.mrf.mxu0  ;;  %v1232_v54 = vpop.f32.mrf.mxu1 }
 0x312   : > { %v1246_v51 = vrot.slane %v1238_v29, %v1245_v44  ;;  %v1253_v11 = vrot.slane %v1239_v21, %v1245_v44 }
 0x314   : > { %v1254_v28 = vcombine.low %v1246_v51, %v1253_v11 }
 0x316   : > { %v1261_v60 = vrot.slane %v1254_v28, %v1245_v44 }
 0x318   : > { %1267 = vst.msk [vmem:[%s312_s15] sm:$0xf] %vm1265_vm2, %v1261_v60 }
 0x319   : > { %1482 = shalt.err (!%p1479_p5)
}
 0x31a   : > { %s1483_s25 = scalar_lea.hbm %s1281_s19, 64  ;;  %s1487_s9 = scalar_lea.hbm %s2094_s7, 128 }
 0x31b   : > { %p1484_p7 = scmp.ne.s32.totalorder %s1281_s19, %s1483_s25  ;;  %p1488_p12 = scmp.lt.s32.totalorder %s1281_s19, %s2094_s7 }
 0x31c   : > { %p1489_p13 = scmp.lt.s32.totalorder %s1487_s9, %s1483_s25 }
 0x31d   : > { %p1485_p10 = pnand %p1484_p7, %p1615_p6 }
 0x31e   : > { %p1490_p0 = por %p1489_p13, %p1488_p12 }
 0x31f   : > { %p1486_p11 = pneg %p1485_p10 }
 0x321   : > { %p1491_p9 = pnand %p1490_p0, %p1486_p11 }
 0x323   : > { %1494 = shalt.err (!%p1491_p9)
}
 0x324   : > { %1402 = dma.vmem_to_hbm [thread:$0]  (%p1615_p6), %s1284_s16, 64, %s1281_s19, %s1269_s20  }
 0x325 PF: > { %s1295_s15 = sand.u32 1, %s1517_s26   ;;  %p2141_p1 = scmp.ge.s32.totalorder %s1529_s29, 2 }
 0x326   : > { %s1296_s17 = scalar_lea.sflag [#allocation5], %s1295_s15 }
 0x327   : > { %p1405_p2 = pnand %p2141_p1, %p1619_p8 }
 0x329   : > { %p1406_p3 = pneg %p1405_p2 }
 0x32b   : > { %1512 = dma.done.wait (%p1406_p3), %s1296_s17, 64  }
 0x32c   : > { %1514 = vsyncadd (%p1406_p3), %s1296_s17, 4294967232  ;;  %p19_p9 = scmp.ge.s32.totalorder %s1600_s8, 4   ;;  %s2142_s26 = smov %s1521_s27 }
 0x32d   : > { %s2143_s27 = smov %s1525_s28  ;;  %s2144_s28 = smov %s1613_s11 }
 0x32e   : > { %s2145_s29 = smov %s1600_s8  ;;  %21 = sbr.rel (!%p19_p9) target bundleno = 6 (0x6), region = 111 }
 0x333   :  { %1301 = vsyncpa [#allocation5], 1 }
 0x334   :  { %1303 = vsyncpa [#allocation5 + $0x1], 1 }

</bundles_post_ra>
